<compile_context>
chip_gen: v6e
topology: v6e:2x2x1
jax: 0.10.0
libtpu: 0.0.40
codegen_flags: <defaults>
</compile_context>

<pallas_src>
import functools

import jax
import jax.numpy as jnp
from jax.experimental import pallas as pl
from jax.experimental.pallas import tpu as pltpu

ALPHA = 0.1  # default negative_slope of the PyTorch LeakyReLU module

_MIB = 1024 * 1024
_VMEM_HEADROOM = 4 * _MIB
_LANE_CANDIDATES = (4096, 2048, 1024, 512, 256, 128)

# Index of the first pallas_call configuration known to compile on this chip
# (bumped past rejected configs so a failed compile is paid at most once).
_CONFIG_START = [0]


def _leaky_relu_kernel(x_ref, o_ref, *, alpha):
    # f32 op-math: matches PyTorch fp32 opmath for half/bf16; no-op for f32.
    x = x_ref[...].astype(jnp.float32)
    if 0.0 <= alpha <= 1.0:
        # max(x, a*x) == where(x > 0, x, a*x) for 0 <= a <= 1:
        # 2 VALU ops (mul + max) instead of 3 (cmp + mul + select).
        y = jnp.maximum(x, x * alpha)
    else:
        y = jnp.where(x > 0, x, x * alpha)
    o_ref[...] = y.astype(o_ref.dtype)


@functools.lru_cache(maxsize=1)
def _vmem_budget_bytes() -> int:
    """~0.75x per-core VMEM; leaves headroom for Mosaic scratch/semaphores."""
    capacity = 64 * _MIB  # conservative default == v7x per-TensorCore VMEM
    try:
        info = pltpu.get_tpu_info()
        cap = getattr(info, "vmem_capacity_bytes", None)
        if cap:
            capacity = int(cap)
    except Exception:
        pass  # query unavailable: keep the conservative default
    return (capacity * 3) // 4


def leaky_relu(x: jax.Array, alpha: float = ALPHA, *, target_block_bytes=None):
    """LeakyReLU: where(x > 0, x, alpha * x), elementwise (memory-bound)."""
    if not jnp.issubdtype(x.dtype, jnp.floating):
        # TODO(synk): integer inputs would need torch-style float promotion.
        raise TypeError("leaky_relu Pallas kernel supports floating dtypes only")

    orig_shape = x.shape
    dtype = x.dtype
    n = x.size
    itemsize = jnp.dtype(dtype).itemsize
    alpha = float(alpha)

    if n == 0:
        return x

    # Lane-dense last dim: widest multiple of 128 that divides n exactly
    # (zero-copy reshape -> long unmasked vst / DMA bursts).
    lanes = next((c for c in _LANE_CANDIDATES if n % c == 0), None)
    if lanes is None:
        # Ragged size (n % 128 != 0). Pre-pad + post-slice would add two full
        # HBM passes (~3x traffic) to a bandwidth-bound op, so use XLA's
        # single-pass fused elementwise instead.
        xf = x.astype(jnp.float32)
        return jnp.where(xf > 0, xf, alpha * xf).astype(dtype)

    rows = n // lanes
    x2d = x.reshape(rows, lanes)

    sublane = max(8, 32 // itemsize)          # 8 (f32) / 16 (bf16) / 32 (int8)
    row_bytes_f32 = lanes * 4                 # in-kernel f32-opmath bytes/row

    # ---- Block sizing (generation-aware, derived from VMEM budget). --------
    vmem_budget = _vmem_budget_bytes()
    # 3 input buffers + 2 output buffers + ~1 block of temporaries must fit.
    max_block_bytes = max(sublane * row_bytes_f32,
                          (vmem_budget - _VMEM_HEADROOM) // 6)
    if target_block_bytes is None:
        target_block_bytes = 8 * _MIB         # ~4-8 MiB after the clamp below
    target_block_bytes = min(max(target_block_bytes, sublane * row_bytes_f32),
                             max_block_bytes)

    if rows < 2 * sublane:
        tile_rows = rows                      # too small to split on sublanes
    else:
        max_rows = max(sublane,
                       (target_block_bytes // row_bytes_f32) // sublane * sublane)
        # >= 2 (ideally even) grid steps so both v7x TensorCores stream.
        num_steps = max(2, pl.cdiv(rows, max_rows))
        if num_steps % 2:
            num_steps += 1
        tile_rows = ((pl.cdiv(rows, num_steps) + sublane - 1) // sublane) * sublane
        tile_rows = min(tile_rows, max_rows)

    grid_steps = pl.cdiv(rows, tile_rows)     # partial tail block is OOB-masked

    kernel = functools.partial(_leaky_relu_kernel, alpha=alpha)
    cost = pl.CostEstimate(flops=2 * n, transcendentals=0,
                           bytes_accessed=2 * n * itemsize)

    def attempt(dim_sem, in_buffers):
        in_spec_kwargs = {}
        if in_buffers is not None:
            # Extra pipeline depth hides DMA-issue latency at step boundaries
            # (this pipeline is pure DMA: ~2 VALU ops per element of compute).
            in_spec_kwargs["pipeline_mode"] = pl.Buffered(in_buffers)
        out = pl.pallas_call(
            kernel,
            out_shape=jax.ShapeDtypeStruct((rows, lanes), dtype),
            grid_spec=pltpu.PrefetchScalarGridSpec(
                num_scalar_prefetch=0,
                grid=(grid_steps,),
                in_specs=[pl.BlockSpec((tile_rows, lanes), lambda i: (i, 0),
                                       **in_spec_kwargs)],
                out_specs=pl.BlockSpec((tile_rows, lanes), lambda i: (i, 0)),
            ),
            compiler_params=pltpu.CompilerParams(
                dimension_semantics=dim_sem,
                vmem_limit_bytes=vmem_budget,
            ),
            cost_estimate=cost,
        )(x2d)
        # Force compile + run inside the caller's try/except so rejected
        # configurations (e.g. CORE_PARALLEL on a single-TC chip) fall back.
        return jax.block_until_ready(out)

    core_parallel = getattr(pltpu, "CORE_PARALLEL", None)
    configs = []
    if core_parallel is not None:
        # Explicitly shard the row axis across v7x's two TensorCores.
        configs.append(((core_parallel,), 3))
    configs.append((("parallel",), 3))        # string semantics + 3-deep input
    configs.append((("parallel",), None))     # proven-safe baseline (2-deep)

    out2d = None
    last_err = None
    for idx in range(min(_CONFIG_START[0], len(configs) - 1), len(configs)):
        dim_sem, in_buffers = configs[idx]
        try:
            out2d = attempt(dim_sem, in_buffers)
            _CONFIG_START[0] = idx
            break
        except Exception as err:              # rejected config -> try the next
            last_err = err
    if out2d is None:
        raise last_err

    return out2d.reshape(orig_shape)


if __name__ == "__main__":
    key = jax.random.PRNGKey(0)
    # Small NCHW input consistent with conv-style activation usage.
    x = jax.random.normal(key, (2, 4, 16, 16), dtype=jnp.float32)
    y = leaky_relu(x)
    jax.block_until_ready(y)
    y_ref = jnp.where(x > 0, x, ALPHA * x)
    assert y.shape == x.shape and y.dtype == x.dtype
    assert jnp.allclose(y, y_ref, atol=1e-6, rtol=1e-6)

    # Multi-block path: >= 2 grid steps and a partial (OOB-masked) tail block.
    x_mb = jax.random.normal(jax.random.PRNGKey(1), (3, 8, 40, 128),
                             dtype=jnp.float32)
    y_mb = leaky_relu(x_mb, target_block_bytes=64 * 1024)
    jax.block_until_ready(y_mb)
    assert jnp.allclose(y_mb, jnp.where(x_mb > 0, x_mb, ALPHA * x_mb),
                        atol=1e-6, rtol=1e-6)

    # Ragged size (n % 128 != 0): single-pass XLA fallback, no pad/slice copies.
    x_odd = jax.random.normal(jax.random.PRNGKey(2), (3, 5, 7), dtype=jnp.float32)
    y_odd = leaky_relu(x_odd)
    jax.block_until_ready(y_odd)
    assert jnp.allclose(y_odd, jnp.where(x_odd > 0, x_odd, ALPHA * x_odd),
                        atol=1e-6, rtol=1e-6)

    print("KERNEL_OK")
</pallas_src>

<mosaic_0001>
module attributes {stable_mosaic.version = 11 : i64} {
  func.func @_leaky_relu_kernel(%arg0: i32, %arg1: memref<1x2048xf32, #tpu.memory_space<vmem>>, %arg2: memref<1x2048xf32, #tpu.memory_space<vmem>>) attributes {dimension_semantics = [#tpu.dimension_semantics<parallel>], iteration_bounds = array<i64: 1>, scalar_prefetch = 0 : i64, scratch_operands = 0 : i64, tpu.core_type = #tpu.core_type<tc>, window_params = [{transform_indices = @transform_0, window_bounds = array<i64: 1, 2048>}, {transform_indices = @transform_1, window_bounds = array<i64: 1, 2048>}]} {
    %c0 = arith.constant 0 : index
    %c0_0 = arith.constant 0 : index
    %0 = vector.load %arg1[%c0, %c0_0] : memref<1x2048xf32, #tpu.memory_space<vmem>>, vector<1x2048xf32>
    %cst = arith.constant 1.000000e-01 : f32
    %1 = vector.broadcast %cst : f32 to vector<1x2048xf32>
    %2 = arith.mulf %0, %1 : vector<1x2048xf32>
    %3 = arith.maximumf %0, %2 : vector<1x2048xf32>
    %c0_1 = arith.constant 0 : index
    %c0_2 = arith.constant 0 : index
    %4 = vector.load %arg2[%c0_1, %c0_2] : memref<1x2048xf32, #tpu.memory_space<vmem>>, vector<1x2048xf32>
    tpu.vector_store %arg2[%c0_1, %c0_2], %3 {strides = array<i32>} : memref<1x2048xf32, #tpu.memory_space<vmem>>, vector<1x2048xf32>,
    return
  }
  func.func @transform_0(%arg0: i32) -> (i32, i32) {
    %c0_i32 = arith.constant 0 : i32
    %c0_i32_0 = arith.constant 0 : i32
    return %arg0, %c0_i32 : i32, i32
  }
  func.func @transform_1(%arg0: i32) -> (i32, i32) {
    %c0_i32 = arith.constant 0 : i32
    %c0_i32_0 = arith.constant 0 : i32
    return %arg0, %c0_i32 : i32, i32
  }
}

</mosaic_0001>

<bundles_post_ra>
// kernel: tpu_custom_call.1
= control target key start
LH: loop header
LB: loop body
LE: loop exit
PB: predicated region body
PF: predicated region fallthrough
CT: control target
= control target key end

     0   :  { %6 = vsyncpa [#allocation3], 0  ;;  %s108_s0 = inlined_call_operand.hbm [shape: f32[1,2048], index: 0, kind: input, shape index: {}]   ;;  %s109_s1 = inlined_call_operand.hbm [shape: f32[1,2048], index: 1, kind: output, shape index: {}]  }
   0x1   :  { %7 = vsyncpa [#allocation4], 0  ;;  %s90_s6 = smov [#allocation2]  }
   0x2   :  { %s14_s7 = sshll.u32 %s90_s6, 4  ;;  %s15_s7 = int_to_ptr.vmem [resolvable:$true] %s14_s7 }
   0x3   :  { %s54_s8 = scalar_lea.vmem %s15_s7, 256  ;;  %p59_p1 = scmp.lt.s32.totalorder %s15_s7, %s15_s7 }
   0x4   :  { %p55_p0 = scmp.ne.s32.totalorder %s15_s7, %s54_s8  ;;  %p60_p2 = scmp.lt.s32.totalorder %s54_s8, %s54_s8 }
   0x6   :  { %p61_p3 = por %p60_p2, %p59_p1 }
   0x8   :  { %p62_p4 = pnand %p61_p3, %p55_p0 }
   0xa   :  { %65 = shalt.err (!%p62_p4)
}
   0xb   :  { %17 = dma.hbm_to_vmem [thread:$0]  %s108_s0, 256, %s15_s7, [#allocation3]  }
   0xc   :  { %86 = dma.done.wait [#allocation3], 256  }
   0xd   :  { %87 = vsyncadd [#allocation3], 4294967040  ;;  %v21_v0 = vld [vmem:[#allocation2] sm:$0xff]  ;;  %v22_v1 = vld [vmem:[#allocation2 + $0x8] sm:$0xff]  ;;  %s91_s11 = smov [#allocation5]  }
   0xe   :  { %s35_s12 = sshll.u32 %s91_s11, 4  ;;  %v23_v2 = vmul.f32 0.1, %v21_v0  ;;  %v24_v3 = vmul.f32 0.1, %v22_v1  ;;  %s36_s12 = int_to_ptr.vmem [resolvable:$true] %s35_s12 }
   0xf   :  { %s66_s13 = scalar_lea.vmem %s36_s12, 256  ;;  %p71_p6 = scmp.lt.s32.totalorder %s36_s12, %s36_s12 }
  0x10   :  { %v25_v4 = vmax.f32 %v21_v0, %v23_v2  ;;  %v26_v5 = vmax.f32 %v22_v1, %v24_v3  ;;  %p67_p5 = scmp.ne.s32.totalorder %s36_s12, %s66_s13  ;;  %p72_p7 = scmp.lt.s32.totalorder %s66_s13, %s66_s13 }
  0x12   :  { %27 = vst [vmem:[#allocation5] sm:$0xff] %v25_v4  ;;  %28 = vst [vmem:[#allocation5 + $0x8] sm:$0xff] %v26_v5  ;;  %p73_p8 = por %p72_p7, %p71_p6 }
  0x14   :  { %p74_p9 = pnand %p73_p8, %p67_p5 }
  0x16   :  { %77 = shalt.err (!%p74_p9)
}
  0x17   :  { %38 = dma.vmem_to_hbm [thread:$0]  %s36_s12, 256, %s109_s1, [#allocation4]  }
  0x18   :  { %88 = dma.done.wait [#allocation4], 256  }
  0x19   :  { %89 = vsyncadd [#allocation4], 4294967040 }
  0x1a   :  { %42 = vsyncpa [#allocation3], 1 }
  0x1b   :  { %43 = vsyncpa [#allocation4], 1 }

</bundles_post_ra>
